<compile_context>
chip_gen: v7x
topology: tpu7x:2x2x1
jax: 0.10.0
libtpu: 0.0.40
codegen_flags: <defaults>
</compile_context>

<pallas_src>
import jax
import jax.numpy as jnp
from jax.experimental import pallas as pl
from jax.experimental.pallas import tpu as pltpu

IN_FEATURES = 99
H1 = 128
H2 = 64
K_PAD = 128   # layer-1 contraction dim padded to a full lane tile (VMEM only)
LANE = 128    # layer-3 weight N padding target (MXU-friendly; store stays C-wide)


def _round_up(n, m):
    return (n + m - 1) // m * m


def pose_mlp_kernel(x_ref, w1_ref, b1_ref, w2_ref, b2_ref, w3_ref, b3_ref,
                    o_ref, xpad_ref):
    """One batch tile of the fused MLP.

    x_ref    : (TM, 99)     native dtype (f32/bf16) input tile
    w1_ref   : (128, 128)   bf16  layer-1 weight, K zero-padded 99 -> 128
    b1_ref   : (1, 128)     f32
    w2_ref   : (128, 64)    bf16
    b2_ref   : (1, 64)      f32
    w3_ref   : (64, C_pad)  bf16  layer-3 weight, N zero-padded C -> C_pad
    b3_ref   : (1, C_pad)   f32   zero-padded
    o_ref    : (TM, C)      f32   true-width output tile (narrow HBM store)
    xpad_ref : (TM, 128)    bf16  VMEM scratch: K-padded bf16 copy of x tile
    """
    tm = xpad_ref.shape[0]
    c = o_ref.shape[1]

    # Zero only the pad columns. Done every step: under 'parallel' megacore
    # sharding each TensorCore has its own scratch and only one core runs
    # step 0, so gating this on program_id(0)==0 would be incorrect.
    xpad_ref[:, IN_FEATURES:] = jnp.zeros((tm, K_PAD - IN_FEATURES),
                                          jnp.bfloat16)
    # In-kernel cast to bf16 (VPU work, hidden under the next tile's DMA);
    # the caller never pre-casts or pads x in HBM.
    xpad_ref[:, :IN_FEATURES] = x_ref[...].astype(jnp.bfloat16)

    # Layer 1: (TM,128) @ (128,128) -> f32 acc, + bias, ReLU
    h1 = jnp.dot(xpad_ref[...], w1_ref[...],
                 preferred_element_type=jnp.float32)
    h1 = jnp.maximum(h1 + b1_ref[...], 0.0)

    # Layer 2: (TM,128) @ (128,64) -> f32 acc, + bias, ReLU
    # NOTE: intermediate activations are re-quantized to bf16 as MXU operands;
    # accumulation stays f32 (small rounding vs the f32 PyTorch model).
    h2 = jnp.dot(h1.astype(jnp.bfloat16), w2_ref[...],
                 preferred_element_type=jnp.float32)
    h2 = jnp.maximum(h2 + b2_ref[...], 0.0)

    # Layer 3: (TM,64) @ (64,C_pad) -> f32 acc, + bias. Store only the true C
    # columns: the HBM writeback is the dominant byte stream, so the narrow
    # store beats a padded 128-lane f32 slab on this memory-bound kernel.
    o_full = jnp.dot(h2.astype(jnp.bfloat16), w3_ref[...],
                     preferred_element_type=jnp.float32) + b3_ref[...]
    o_ref[...] = o_full[:, :c]


def pose_cnn_forward(x, params, *, tile_m=4096):
    """Fused PoseCNN forward. x: (B, 99); returns (B, num_classes) float32."""
    w1, b1, w2, b2, w3, b3 = params
    B = x.shape[0]
    C = w3.shape[1]
    C_pad = _round_up(max(C, LANE), LANE)

    # Weight/bias padding + bf16 cast (tiny, constant-foldable under jit).
    w1p = jnp.pad(w1, ((0, K_PAD - IN_FEATURES), (0, 0))).astype(jnp.bfloat16)
    w2c = w2.astype(jnp.bfloat16)
    w3p = jnp.pad(w3, ((0, 0), (0, C_pad - C))).astype(jnp.bfloat16)
    b1c = b1.astype(jnp.float32)
    b2c = b2.astype(jnp.float32)
    b3p = jnp.pad(b3, ((0, 0), (0, C_pad - C))).astype(jnp.float32)

    # Batch tiling: large tile (default 4096 rows) amortizes the ~0.35us
    # per-grid-step overhead. Ragged grid (cdiv) avoids an HBM pad pass over
    # x: garbage rows of a partial last block only flow to output rows past B,
    # which Pallas never writes back, and there is no reduction across rows.
    TM = min(tile_m, _round_up(B, 8))
    grid = (pl.cdiv(B, TM),)

    flops = 2 * B * (K_PAD * H1 + H1 * H2 + H2 * C_pad)
    bytes_accessed = (x.size * x.dtype.itemsize          # x read once
                      + B * C * 4                        # narrow f32 output
                      + (w1p.size + w2c.size + w3p.size) * 2
                      + (b1c.size + b2c.size + b3p.size) * 4)

    out = pl.pallas_call(
        pose_mlp_kernel,
        out_shape=jax.ShapeDtypeStruct((B, C), jnp.float32),
        grid_spec=pltpu.PrefetchScalarGridSpec(
            num_scalar_prefetch=0,
            grid=grid,
            in_specs=[
                # x: tiled over the batch axis (double-buffered pipeline).
                pl.BlockSpec((TM, IN_FEATURES), lambda i: (i, 0)),
                # Weights & biases: constant index_map -> DMA'd once,
                # VMEM-resident across all batch tiles.
                pl.BlockSpec((K_PAD, H1), lambda i: (0, 0)),
                pl.BlockSpec((1, H1), lambda i: (0, 0)),
                pl.BlockSpec((H1, H2), lambda i: (0, 0)),
                pl.BlockSpec((1, H2), lambda i: (0, 0)),
                pl.BlockSpec((H2, C_pad), lambda i: (0, 0)),
                pl.BlockSpec((1, C_pad), lambda i: (0, 0)),
            ],
            out_specs=pl.BlockSpec((TM, C), lambda i: (i, 0)),
            scratch_shapes=[pltpu.VMEM((TM, K_PAD), jnp.bfloat16)],
        ),
        compiler_params=pltpu.CompilerParams(
            # Batch axis shards across the 2 TensorCores on v7x; explicit
            # 32 MiB VMEM limit also covers v5e's 16 MiB scoped default.
            dimension_semantics=("parallel",),
            vmem_limit_bytes=32 * 1024 * 1024,
        ),
        cost_estimate=pl.CostEstimate(
            flops=flops, transcendentals=0, bytes_accessed=bytes_accessed),
    )(x, w1p, b1c, w2c, b2c, w3p, b3p)

    return out


def init_params(key, num_classes):
    """Deterministic init matching PyTorch nn.Linear default U[-1/sqrt(fan_in), +]."""
    dims = [(IN_FEATURES, H1), (H1, H2), (H2, num_classes)]
    params = []
    for fan_in, fan_out in dims:
        key, kw, kb = jax.random.split(key, 3)
        bound = 1.0 / jnp.sqrt(float(fan_in))
        w = jax.random.uniform(kw, (fan_in, fan_out), jnp.float32, -bound, bound)
        b = jax.random.uniform(kb, (1, fan_out), jnp.float32, -bound, bound)
        params.extend([w, b])
    return tuple(params)


def reference_forward(x, params, *, match_kernel_dtypes=False):
    """Pure-JAX reference. match_kernel_dtypes mimics the kernel's bf16 operands."""
    w1, b1, w2, b2, w3, b3 = params
    cast = (lambda a: a.astype(jnp.bfloat16)) if match_kernel_dtypes else (lambda a: a)
    h1 = jnp.maximum(
        jnp.dot(cast(x), cast(w1), preferred_element_type=jnp.float32) + b1, 0.0)
    h2 = jnp.maximum(
        jnp.dot(cast(h1), cast(w2), preferred_element_type=jnp.float32) + b2, 0.0)
    return jnp.dot(cast(h2), cast(w3), preferred_element_type=jnp.float32) + b3


if __name__ == "__main__":
    key = jax.random.PRNGKey(0)
    k_x, k_p = jax.random.split(key)

    batch = 8
    num_classes = 10
    x = jax.random.normal(k_x, (batch, IN_FEATURES), jnp.float32)
    params = init_params(k_p, num_classes)

    fwd = jax.jit(pose_cnn_forward)
    out = jax.block_until_ready(fwd(x, params))
    assert out.shape == (batch, num_classes)
    assert out.dtype == jnp.float32

    # Check against a reference using the same bf16 MXU operands.
    ref_bf16 = reference_forward(x, params, match_kernel_dtypes=True)
    assert jnp.allclose(out, ref_bf16, atol=1e-2, rtol=1e-2), "mismatch vs bf16 ref"
    # Loose check against the full-f32 reference (bf16 operand rounding only).
    ref_f32 = reference_forward(x, params)
    assert jnp.allclose(out, ref_f32, atol=5e-2, rtol=5e-2), "mismatch vs f32 ref"

    print("KERNEL_OK")
</pallas_src>

<mosaic_0001>
module attributes {stable_mosaic.version = 11 : i64} {
  func.func @pose_mlp_kernel(%arg0: i32, %arg1: memref<8x99xf32, #tpu.memory_space<vmem>>, %arg2: memref<128x128xbf16, #tpu.memory_space<vmem>>, %arg3: memref<1x128xf32, #tpu.memory_space<vmem>>, %arg4: memref<128x64xbf16, #tpu.memory_space<vmem>>, %arg5: memref<1x64xf32, #tpu.memory_space<vmem>>, %arg6: memref<64x128xbf16, #tpu.memory_space<vmem>>, %arg7: memref<1x128xf32, #tpu.memory_space<vmem>>, %arg8: memref<8x10xf32, #tpu.memory_space<vmem>>, %arg9: memref<8x128xbf16, #tpu.memory_space<vmem>>) attributes {dimension_semantics = [#tpu.dimension_semantics<parallel>], iteration_bounds = array<i64: 1>, scalar_prefetch = 0 : i64, scratch_operands = 1 : i64, tpu.core_type = #tpu.core_type<tc>, window_params = [{transform_indices = @transform_0, window_bounds = array<i64: 8, 99>}, {pipeline_mode = #tpu.pipeline_mode<synchronous>, transform_indices = @transform_1, window_bounds = array<i64: 128, 128>}, {pipeline_mode = #tpu.pipeline_mode<synchronous>, transform_indices = @transform_2, window_bounds = array<i64: 1, 128>}, {pipeline_mode = #tpu.pipeline_mode<synchronous>, transform_indices = @transform_3, window_bounds = array<i64: 128, 64>}, {pipeline_mode = #tpu.pipeline_mode<synchronous>, transform_indices = @transform_4, window_bounds = array<i64: 1, 64>}, {pipeline_mode = #tpu.pipeline_mode<synchronous>, transform_indices = @transform_5, window_bounds = array<i64: 64, 128>}, {pipeline_mode = #tpu.pipeline_mode<synchronous>, transform_indices = @transform_6, window_bounds = array<i64: 1, 128>}, {transform_indices = @transform_7, window_bounds = array<i64: 8, 10>}]} {
    %cst = arith.constant 0.000000e+00 : bf16
    %0 = vector.broadcast %cst : bf16 to vector<8x29xbf16>
    %c0 = arith.constant 0 : index
    %c99 = arith.constant 99 : index
    %1 = vector.load %arg9[%c0, %c99] : memref<8x128xbf16, #tpu.memory_space<vmem>>, vector<8x29xbf16>
    tpu.vector_store %arg9[%c0, %c99], %0 {strides = array<i32>} : memref<8x128xbf16, #tpu.memory_space<vmem>>, vector<8x29xbf16>,
    %c0_0 = arith.constant 0 : index
    %c0_1 = arith.constant 0 : index
    %2 = vector.load %arg1[%c0_0, %c0_1] : memref<8x99xf32, #tpu.memory_space<vmem>>, vector<8x99xf32>
    %3 = arith.truncf %2 : vector<8x99xf32> to vector<8x99xbf16>
    %c0_2 = arith.constant 0 : index
    %c0_3 = arith.constant 0 : index
    %4 = vector.load %arg9[%c0_2, %c0_3] : memref<8x128xbf16, #tpu.memory_space<vmem>>, vector<8x99xbf16>
    tpu.vector_store %arg9[%c0_2, %c0_3], %3 {strides = array<i32>} : memref<8x128xbf16, #tpu.memory_space<vmem>>, vector<8x99xbf16>,
    %c0_4 = arith.constant 0 : index
    %c0_5 = arith.constant 0 : index
    %5 = vector.load %arg9[%c0_4, %c0_5] : memref<8x128xbf16, #tpu.memory_space<vmem>>, vector<8x128xbf16>
    %c0_6 = arith.constant 0 : index
    %c0_7 = arith.constant 0 : index
    %6 = vector.load %arg2[%c0_6, %c0_7] : memref<128x128xbf16, #tpu.memory_space<vmem>>, vector<128x128xbf16>
    %cst_8 = arith.constant dense<0.000000e+00> : vector<8x128xf32>
    %7 = tpu.matmul %5, %6, %cst_8 {dimension_numbers = #tpu.dot_dimension_numbers<[1], [0], [0], [1], [0, 0, 1, 1], [], []>} : vector<8x128xbf16>, vector<128x128xbf16>, vector<8x128xf32> -> vector<8x128xf32>
    %c0_9 = arith.constant 0 : index
    %c0_10 = arith.constant 0 : index
    %8 = vector.load %arg3[%c0_9, %c0_10] : memref<1x128xf32, #tpu.memory_space<vmem>>, vector<1x128xf32>
    %9 = vector.broadcast %8 : vector<1x128xf32> to vector<8x128xf32>
    %10 = arith.addf %7, %9 : vector<8x128xf32>
    %cst_11 = arith.constant 0.000000e+00 : f32
    %11 = vector.broadcast %cst_11 : f32 to vector<8x128xf32>
    %12 = arith.maximumf %10, %11 : vector<8x128xf32>
    %13 = arith.truncf %12 : vector<8x128xf32> to vector<8x128xbf16>
    %c0_12 = arith.constant 0 : index
    %c0_13 = arith.constant 0 : index
    %14 = vector.load %arg4[%c0_12, %c0_13] : memref<128x64xbf16, #tpu.memory_space<vmem>>, vector<128x64xbf16>
    %cst_14 = arith.constant dense<0.000000e+00> : vector<8x64xf32>
    %15 = tpu.matmul %13, %14, %cst_14 {dimension_numbers = #tpu.dot_dimension_numbers<[1], [0], [0], [1], [0, 0, 1, 1], [], []>} : vector<8x128xbf16>, vector<128x64xbf16>, vector<8x64xf32> -> vector<8x64xf32>
    %c0_15 = arith.constant 0 : index
    %c0_16 = arith.constant 0 : index
    %16 = vector.load %arg5[%c0_15, %c0_16] : memref<1x64xf32, #tpu.memory_space<vmem>>, vector<1x64xf32>
    %17 = vector.broadcast %16 : vector<1x64xf32> to vector<8x64xf32>
    %18 = arith.addf %15, %17 : vector<8x64xf32>
    %cst_17 = arith.constant 0.000000e+00 : f32
    %19 = vector.broadcast %cst_17 : f32 to vector<8x64xf32>
    %20 = arith.maximumf %18, %19 : vector<8x64xf32>
    %21 = arith.truncf %20 : vector<8x64xf32> to vector<8x64xbf16>
    %c0_18 = arith.constant 0 : index
    %c0_19 = arith.constant 0 : index
    %22 = vector.load %arg6[%c0_18, %c0_19] : memref<64x128xbf16, #tpu.memory_space<vmem>>, vector<64x128xbf16>
    %cst_20 = arith.constant dense<0.000000e+00> : vector<8x128xf32>
    %23 = tpu.matmul %21, %22, %cst_20 {dimension_numbers = #tpu.dot_dimension_numbers<[1], [0], [0], [1], [0, 0, 1, 1], [], []>} : vector<8x64xbf16>, vector<64x128xbf16>, vector<8x128xf32> -> vector<8x128xf32>
    %c0_21 = arith.constant 0 : index
    %c0_22 = arith.constant 0 : index
    %24 = vector.load %arg7[%c0_21, %c0_22] : memref<1x128xf32, #tpu.memory_space<vmem>>, vector<1x128xf32>
    %25 = vector.broadcast %24 : vector<1x128xf32> to vector<8x128xf32>
    %26 = arith.addf %23, %25 : vector<8x128xf32>
    %27 = vector.extract_strided_slice %26 {offsets = [0, 0], sizes = [8, 10], strides = [1, 1]} : vector<8x128xf32> to vector<8x10xf32>
    %c0_23 = arith.constant 0 : index
    %c0_24 = arith.constant 0 : index
    %28 = vector.load %arg8[%c0_23, %c0_24] : memref<8x10xf32, #tpu.memory_space<vmem>>, vector<8x10xf32>
    tpu.vector_store %arg8[%c0_23, %c0_24], %27 {strides = array<i32>} : memref<8x10xf32, #tpu.memory_space<vmem>>, vector<8x10xf32>,
    return
  }
  func.func @transform_0(%arg0: i32) -> (i32, i32) {
    %c0_i32 = arith.constant 0 : i32
    %c0_i32_0 = arith.constant 0 : i32
    return %arg0, %c0_i32 : i32, i32
  }
  func.func @transform_1(%arg0: i32) -> (i32, i32) {
    %c0_i32 = arith.constant 0 : i32
    %c0_i32_0 = arith.constant 0 : i32
    %c0_i32_1 = arith.constant 0 : i32
    return %c0_i32, %c0_i32_0 : i32, i32
  }
  func.func @transform_2(%arg0: i32) -> (i32, i32) {
    %c0_i32 = arith.constant 0 : i32
    %c0_i32_0 = arith.constant 0 : i32
    %c0_i32_1 = arith.constant 0 : i32
    return %c0_i32, %c0_i32_0 : i32, i32
  }
  func.func @transform_3(%arg0: i32) -> (i32, i32) {
    %c0_i32 = arith.constant 0 : i32
    %c0_i32_0 = arith.constant 0 : i32
    %c0_i32_1 = arith.constant 0 : i32
    return %c0_i32, %c0_i32_0 : i32, i32
  }
  func.func @transform_4(%arg0: i32) -> (i32, i32) {
    %c0_i32 = arith.constant 0 : i32
    %c0_i32_0 = arith.constant 0 : i32
    %c0_i32_1 = arith.constant 0 : i32
    return %c0_i32, %c0_i32_0 : i32, i32
  }
  func.func @transform_5(%arg0: i32) -> (i32, i32) {
    %c0_i32 = arith.constant 0 : i32
    %c0_i32_0 = arith.constant 0 : i32
    %c0_i32_1 = arith.constant 0 : i32
    return %c0_i32, %c0_i32_0 : i32, i32
  }
  func.func @transform_6(%arg0: i32) -> (i32, i32) {
    %c0_i32 = arith.constant 0 : i32
    %c0_i32_0 = arith.constant 0 : i32
    %c0_i32_1 = arith.constant 0 : i32
    return %c0_i32, %c0_i32_0 : i32, i32
  }
  func.func @transform_7(%arg0: i32) -> (i32, i32) {
    %c0_i32 = arith.constant 0 : i32
    %c0_i32_0 = arith.constant 0 : i32
    return %arg0, %c0_i32 : i32, i32
  }
}

</mosaic_0001>

<bundles_post_ra>
// kernel: pose_cnn_forward.1
= control target key start
LH: loop header
LB: loop body
LE: loop exit
PB: predicated region body
PF: predicated region fallthrough
CT: control target
= control target key end

     0   :  { %v507_v1 = vmov 0.0   ;;  %vm508_vm0 = vmmov 0   ;;  %vm28_vm1 = vcmask 1044248   ;;  %v509_v3 = vmov 0   ;;  %s661_s0 = inlined_call_operand.vmem [shape: f32[8,99], index: 0, kind: input, shape index: {}]   ;;  %s662_s1 = inlined_call_operand.vmem [shape: bf16[128,128], index: 1, kind: input, shape index: {}]   ;;  %s663_s2 = inlined_call_operand.vmem [shape: f32[1,128], index: 2, kind: input, shape index: {}]   ;;  %s664_s3 = inlined_call_operand.vmem [shape: bf16[128,64], index: 3, kind: input, shape index: {}]   ;;  %s665_s4 = inlined_call_operand.vmem [shape: f32[1,64], index: 4, kind: input, shape index: {}]   ;;  %s666_s5 = inlined_call_operand.vmem [shape: bf16[64,128], index: 5, kind: input, shape index: {}]   ;;  %s667_s6 = inlined_call_operand.vmem [shape: f32[1,128], index: 6, kind: input, shape index: {}]   ;;  %s668_s7 = inlined_call_operand.hbm [shape: f32[8,10], index: 7, kind: output, shape index: {}]  }
   0x1   :  { %v463_v0 = vld [vmem:[%s662_s1] sm:$0xff]   ;;  %407 = vmatprep.subr.bf16.mxu0 %v507_v1  ;;  %427 = vmatprep.subr.bf16.mxu1 %v507_v1  ;;  %v464_v2 = vld [vmem:[%s662_s1 + $0x8] sm:$0xff]   ;;  %29 = vst.msk [vmem:[#allocation2] sm:$0xf] %vm28_vm1, %v509_v3  ;;  %v465_v4 = vld [vmem:[%s662_s1 + $0x10] sm:$0xff]   ;;  %vm32_vm2 = vcmask 805888  }
   0x2   :  { %408 = vmatpush3.bf16.msra.mxu0 %v463_v0  ;;  %423 = vmatprep.mubr.msk.bf16.mxu0 %vm508_vm0, %v507_v1  ;;  %v30_v5 = vld [vmem:[%s661_s0] sm:$0xff]  ;;  %v466_v8 = vld [vmem:[%s662_s1 + $0x18] sm:$0xff]   ;;  %v472_v9 = vld [vmem:[%s664_s3 + $0x8] sm:$0xff]  }
   0x3   :  { %409 = vmatprep.subr.bf16.mxu0 %v507_v1  ;;  %443 = vmatprep.mubr.msk.bf16.mxu1 %vm508_vm0, %v507_v1  ;;  %v31_v6 = vpack.c.bf16 %v30_v5, %v30_v5  ;;  %v471_v7 = vld [vmem:[%s664_s3] sm:$0xff]   ;;  %v473_v11 = vld [vmem:[%s664_s3 + $0x10] sm:$0xff]   ;;  %v468_v12 = vld [vmem:[%s662_s1 + $0x28] sm:$0xff]  }
   0x4   :  { %428 = vmatpush3.bf16.msra.mxu1 %v471_v7  ;;  %v467_v10 = vld [vmem:[%s662_s1 + $0x20] sm:$0xff]   ;;  %v474_v13 = vld [vmem:[%s664_s3 + $0x18] sm:$0xff]  }
   0x5   :  { %33 = vst.msk [vmem:[#allocation2] sm:$0xf] %vm32_vm2, %v31_v6  ;;  %429 = vmatprep.subr.bf16.mxu1 %v507_v1 }
   0x6   :  { %410 = vmatpush3.bf16.msra.mxu0 %v464_v2 }
   0x7   :  { %411 = vmatprep.subr.bf16.mxu0 %v507_v1 }
   0x8   :  { %430 = vmatpush3.bf16.msra.mxu1 %v472_v9 }
   0x9   :  { %431 = vmatprep.subr.bf16.mxu1 %v507_v1 }
   0xa   :  { %412 = vmatpush3.bf16.msra.mxu0 %v465_v4 }
   0xb   :  { %413 = vmatprep.subr.bf16.mxu0 %v507_v1 }
   0xc   :  { %432 = vmatpush3.bf16.msra.mxu1 %v473_v11 }
   0xe   :  { %414 = vmatpush3.bf16.msra.mxu0 %v466_v8 }
   0xf   :  { %415 = vmatprep.subr.bf16.mxu0 %v507_v1 }
  0x12   :  { %416 = vmatpush3.bf16.msra.mxu0 %v467_v10 }
  0x13   :  { %417 = vmatprep.subr.bf16.mxu0 %v507_v1 }
  0x14   :  { %12 = vsyncpa [#allocation4], 0  ;;  %433 = vmatprep.subr.bf16.mxu1 %v507_v1  ;;  %v469_v14 = vld [vmem:[%s662_s1 + $0x30] sm:$0xff]   ;;  %v475_v15 = vld [vmem:[%s664_s3 + $0x20] sm:$0xff]   ;;  %vm300_vm3 = vcmask 523264   ;;  %s510_s21 = smov [#allocation3]  }
  0x15   :  { %434 = vmatpush3.bf16.msra.mxu1 %v474_v13  ;;  %v470_v16 = vld [vmem:[%s662_s1 + $0x38] sm:$0xff]   ;;  %v476_v17 = vld [vmem:[%s664_s3 + $0x28] sm:$0xff]   ;;  %v34_v18 = vld [vmem:[#allocation2] sm:$0xf]  ;;  %vm344_vm4 = vcmask 80896  }
  0x16   :  { %418 = vmatpush3.bf16.msra.mxu0 %v468_v12  ;;  %435 = vmatprep.subr.bf16.mxu1 %v507_v1  ;;  %v477_v19 = vld [vmem:[%s664_s3 + $0x30] sm:$0xff]   ;;  %v478_v20 = vld [vmem:[%s664_s3 + $0x38] sm:$0xff]   ;;  %v479_v21 = vld [vmem:[%s666_s5] sm:$0xff]  }
  0x17   :  { %419 = vmatprep.subr.bf16.mxu0 %v507_v1  ;;  %v480_v22 = vld [vmem:[%s666_s5 + $0x8] sm:$0xff]   ;;  %v360_v23 = vld [vmem:[%s663_s2] ss:$0 sm:$0xff]  ;;  %v481_v31 = vld [vmem:[%s666_s5 + $0x10] sm:$0xff]  }
  0x18   :  { %v482_v32 = vld [vmem:[%s666_s5 + $0x18] sm:$0xff]   ;;  %v369_v33 = vld [vmem:[%s665_s4] ss:$0 sm:$0xff]  ;;  %s352_s5 = sshll.u32 %s510_s21, 4  ;;  %s353_s5 = int_to_ptr.vmem [resolvable:$true] %s352_s5 }
  0x19   :  { %436 = vmatpush3.bf16.msra.mxu1 %v475_v15  ;;  %v378_v41 = vld [vmem:[%s667_s6] ss:$0 sm:$0xff]  ;;  %s483_s4 = scalar_lea.vmem %s353_s5, 128  ;;  %p488_p1 = scmp.lt.s32.totalorder %s353_s5, %s353_s5 }
  0x1a   :  { %420 = vmatpush3.bf16.msra.mxu0 %v469_v14  ;;  %437 = vmatprep.subr.bf16.mxu1 %v507_v1  ;;  %p484_p0 = scmp.ne.s32.totalorder %s353_s5, %s483_s4  ;;  %p489_p2 = scmp.lt.s32.totalorder %s483_s4, %s483_s4 }
  0x1b   :  { %421 = vmatprep.subr.bf16.mxu0 %v507_v1 }
  0x1c   :  { %p490_p3 = por %p489_p2, %p488_p1 }
  0x1d   :  { %438 = vmatpush3.bf16.msra.mxu1 %v476_v17 }
  0x1e   :  { %422 = vmatpush3.bf16.msra.mxu0 %v470_v16  ;;  %439 = vmatprep.subr.bf16.mxu1 %v507_v1  ;;  %p491_p4 = pnand %p490_p3, %p484_p0 }
  0x1f   :  { %447 = vmatprep.subr.bf16.mxu0 %v507_v1 }
  0x21   :  { %424 = vmatmul.mubr.bf16.vlgmr.msra.gmra.mrb[0].mxu0 %v34_v18  ;;  %440 = vmatpush3.bf16.msra.mxu1 %v477_v19 }
  0x22   :  { %455 = vmatprep.mubr.msk.bf16.mxu0 %vm508_vm0, %v507_v1  ;;  %441 = vmatprep.subr.bf16.mxu1 %v507_v1 }
  0x23   :  { %448 = vmatpush3.bf16.msra.mxu0 %v479_v21 }
  0x24   :  { %449 = vmatprep.subr.bf16.mxu0 %v507_v1 }
  0x25   :  { %442 = vmatpush3.bf16.msra.mxu1 %v478_v20 }
  0x27   :  { %450 = vmatpush3.bf16.msra.mxu0 %v480_v22 }
  0x28   :  { %451 = vmatprep.subr.bf16.mxu0 %v507_v1 }
  0x2b   :  { %452 = vmatpush3.bf16.msra.mxu0 %v481_v31 }
  0x2c   :  { %453 = vmatprep.subr.bf16.mxu0 %v507_v1 }
  0x2f   :  { %454 = vmatpush3.bf16.msra.mxu0 %v482_v32 }
  0xf4   :  { %v140_v24 = vpop.f32.mrb[0].mxu0 }
  0xf5   :  { %v141_v25 = vadd.f32 %v360_v23, %v140_v24  ;;  %v425_v26 = vpop.f32.mrb[1].mxu0 }
  0xf6   :  { %v143_v27 = vpop.f32.mrb[2].mxu0 }
  0xf7   :  { %v146_v28 = vmax.f32 %v141_v25, 0.0  ;;  %v426_v29 = vpop.f32.mrb[3].mxu0 }
  0xf9   :  { %v147_v30 = vpack.c.bf16 %v146_v28, %v146_v28 }
  0xfb   :  { %444 = vmatmul.mubr.bf16.vlgmr.msra.gmra.mrb[0].mxu1 %v147_v30 }
 0x1ce   :  { %v253_v34 = vpop.f32.mrb[0].mxu1 }
 0x1cf   :  { %v254_v35 = vadd.f32 %v369_v33, %v253_v34  ;;  %v445_v36 = vpop.f32.mrb[1].mxu1 }
 0x1d0   :  { %v256_v37 = vpop.f32.mrb[2].mxu1 }
 0x1d1   :  { %v259_v38 = vmax.f32 %v254_v35, 0.0  ;;  %v446_v39 = vpop.f32.mrb[3].mxu1 }
 0x1d3   :  { %v260_v40 = vpack.c.bf16 %v259_v38, %v259_v38 }
 0x1d5   :  { %456 = vmatmul.mubr.msk.bf16.vlgmr.msra.gmra.mrb[4].mxu0 %vm300_vm3, %v260_v40 }
 0x2a8   :  { %v338_v42 = vpop.f32.mrb[4].mxu0 }
 0x2a9   :  { %v339_v43 = vadd.f32 %v378_v41, %v338_v42  ;;  %v457_v44 = vpop.f32.mrb[5].mxu0 }
 0x2aa   :  { %v341_v45 = vpop.f32.mrb[6].mxu0 }
 0x2ab   :  { %v458_v46 = vpop.f32.mrb[7].mxu0  ;;  %345 = vst.msk [vmem:[#allocation3] sm:$0xff] %vm344_vm4, %v339_v43 }
 0x2ac   :  { %494 = shalt.err (!%p491_p4)
}
 0x2ad   :  { %s495_s6 = scalar_lea.hbm %s668_s7, 128 }
 0x2ae   :  { %p496_p5 = scmp.ne.s32.totalorder %s668_s7, %s495_s6  ;;  %p499_p6 = scmp.lt.u32.totalorder %s495_s6, %s668_s7 }
 0x2b0   :  { %p501_p7 = pnand %p499_p6, %p496_p5 }
 0x2b2   :  { %504 = shalt.err (!%p501_p7)
}
 0x2b3   :  { %355 = dma.vmem_to_hbm [thread:$0]  %s353_s5, 128, %s668_s7, [#allocation4]  }
 0x2b4   :  { %505 = dma.done.wait [#allocation4], 128  }
 0x2b5   :  { %506 = vsyncadd [#allocation4], 4294967168 }
 0x2b6   :  { %359 = vsyncpa [#allocation4], 1 }

</bundles_post_ra>
